<compile_context>
chip_gen: v6e
topology: v6e:2x2x1
jax: 0.10.0
libtpu: 0.0.40
codegen_flags: <defaults>
</compile_context>

<pallas_src>
import math

import jax
import jax.numpy as jnp
from jax.experimental import pallas as pl
from jax.experimental.pallas import tpu as pltpu


def _attention_weights(x, w):
    """Shared score / tanh / softmax path.  x: (Bb, T, H), w: (1, H)."""
    # weights = bmm(inputs, att_weights^T): an (T,H)@(H,1) mat-vec per row.
    # N=1 output -> do it on the VPU/XLU (mul + lane reduce), not the MXU.
    scores = jnp.sum(x * w[0], axis=-1, keepdims=True)           # (Bb, T, 1)
    t = jnp.tanh(scores)
    # softmax over the sequence axis (dim=1 in torch).
    m = jnp.max(t, axis=1, keepdims=True)
    e = jnp.exp(t - m)
    denom = jnp.sum(e, axis=1, keepdims=True)
    return e * pl.reciprocal(denom, approx=True)                 # (Bb, T, 1)


def _self_attention_full_kernel(x_ref, noise_ref, w_ref, avg_ref, std_ref):
    # x_ref:     (Bb, T, H) tile of the batch
    # noise_ref: (Bb, T, H) tile of host-generated 1e-5 * randn noise
    # w_ref:     (1, H) attention weight vector (shared across batch)
    # avg_ref:   (Bb, H)   weighted.sum(1)
    # std_ref:   (Bb, H)   (weighted + noise).std(1), unbiased
    x = x_ref[...]
    w = w_ref[...]
    T = x.shape[1]

    attn = _attention_weights(x, w)
    weighted = x * attn                                          # (Bb, T, H)
    avg_ref[...] = jnp.sum(weighted, axis=1)

    wn = weighted + noise_ref[...]
    mean = jnp.mean(wn, axis=1, keepdims=True)
    # Unbiased (correction=1) variance, two-pass form for numerical stability.
    # NOTE: T == 1 yields inf/NaN, matching torch.std(unbiased=True).
    var = jnp.sum((wn - mean) ** 2, axis=1) / (T - 1)
    std_ref[...] = jnp.sqrt(var)


def _self_attention_mean_kernel(x_ref, w_ref, avg_ref):
    x = x_ref[...]
    attn = _attention_weights(x, w_ref[...])
    avg_ref[...] = jnp.sum(x * attn, axis=1)


def _pick_block_b(B):
    """Pick a sublane-friendly batch tile (8..32 rows); keep >= 2 grid steps
    when possible so both v7x TensorCores get work."""
    candidates = [bb for bb in (32, 16, 8) if B % bb == 0]
    for bb in candidates:
        if B // bb >= 2:
            return bb
    if candidates:
        return candidates[0]
    return B  # small / odd batch: one block covering the whole batch


def self_attention(x, att_weights, *, mean_only=False, noise_key=None):
    """x: (B, T, H) f32, att_weights: (1, H) f32 -> (B, 2H) or (B, H)."""
    B, T, H = x.shape
    Bb = _pick_block_b(B)
    grid = (B // Bb,)
    cp = pltpu.CompilerParams(dimension_semantics=("parallel",))

    if mean_only:
        # Specialized path: no noise input, no std math, (B, H) output.
        return pl.pallas_call(
            _self_attention_mean_kernel,
            out_shape=jax.ShapeDtypeStruct((B, H), x.dtype),
            grid_spec=pltpu.PrefetchScalarGridSpec(
                num_scalar_prefetch=0,
                grid=grid,
                in_specs=[
                    pl.BlockSpec((Bb, T, H), lambda b: (b, 0, 0)),
                    pl.BlockSpec((1, H), lambda b: (0, 0)),
                ],
                out_specs=pl.BlockSpec((Bb, H), lambda b: (b, 0)),
            ),
            compiler_params=cp,
        )(x, att_weights)

    if noise_key is None:
        noise_key = jax.random.PRNGKey(0)
    # Host-side gaussian noise (matches torch: noise = 1e-5 * randn(weighted.size())).
    noise = (1e-5 * jax.random.normal(noise_key, (B, T, H))).astype(x.dtype)

    avg, std = pl.pallas_call(
        _self_attention_full_kernel,
        out_shape=(jax.ShapeDtypeStruct((B, H), x.dtype),
                   jax.ShapeDtypeStruct((B, H), x.dtype)),
        grid_spec=pltpu.PrefetchScalarGridSpec(
            num_scalar_prefetch=0,
            grid=grid,
            in_specs=[
                pl.BlockSpec((Bb, T, H), lambda b: (b, 0, 0)),
                pl.BlockSpec((Bb, T, H), lambda b: (b, 0, 0)),
                pl.BlockSpec((1, H), lambda b: (0, 0)),
            ],
            out_specs=[
                pl.BlockSpec((Bb, H), lambda b: (b, 0)),
                pl.BlockSpec((Bb, H), lambda b: (b, 0)),
            ],
        ),
        compiler_params=cp,
    )(x, noise, att_weights)
    return jnp.concatenate([avg, std], axis=1)


if __name__ == "__main__":
    key = jax.random.PRNGKey(0)
    B, T, H = 16, 8, 32
    k_x, k_w, k_n = jax.random.split(key, 3)

    x = jax.random.normal(k_x, (B, T, H), dtype=jnp.float32)

    # Deterministic kaiming_uniform_ init for att_weights (1, H):
    # fan_in = H, gain = sqrt(2), bound = gain * sqrt(3 / fan_in)
    bound = math.sqrt(2.0) * math.sqrt(3.0 / H)
    att_weights = jax.random.uniform(
        k_w, (1, H), minval=-bound, maxval=bound, dtype=jnp.float32)

    out = self_attention(x, att_weights, noise_key=k_n)
    jax.block_until_ready(out)
    assert out.shape == (B, 2 * H), out.shape

    out_mean = self_attention(x, att_weights, mean_only=True)
    jax.block_until_ready(out_mean)
    assert out_mean.shape == (B, H), out_mean.shape

    # Sanity check against a pure-JAX reference (loose tolerance: approximate
    # EUP reciprocal in the in-kernel softmax).
    scores = jnp.einsum("bth,h->bt", x, att_weights[0])
    attn = jax.nn.softmax(jnp.tanh(scores), axis=1)
    weighted = x * attn[..., None]
    ref_noise = (1e-5 * jax.random.normal(k_n, (B, T, H))).astype(x.dtype)
    ref_avg = jnp.sum(weighted, axis=1)
    ref_std = jnp.std(weighted + ref_noise, axis=1, ddof=1)
    assert jnp.allclose(out_mean, ref_avg, atol=5e-3, rtol=5e-3)
    assert jnp.allclose(out[:, :H], ref_avg, atol=5e-3, rtol=5e-3)
    assert jnp.allclose(out[:, H:], ref_std, atol=1e-2, rtol=1e-2)

    print("KERNEL_OK")
</pallas_src>

<mosaic_0001>
module attributes {stable_mosaic.version = 11 : i64} {
  func.func @_self_attention_full_kernel(%arg0: i32, %arg1: memref<8x8x32xf32, #tpu.memory_space<vmem>>, %arg2: memref<8x8x32xf32, #tpu.memory_space<vmem>>, %arg3: memref<1x32xf32, #tpu.memory_space<vmem>>, %arg4: memref<8x32xf32, #tpu.memory_space<vmem>>, %arg5: memref<8x32xf32, #tpu.memory_space<vmem>>) attributes {dimension_semantics = [#tpu.dimension_semantics<parallel>], iteration_bounds = array<i64: 2>, scalar_prefetch = 0 : i64, scratch_operands = 0 : i64, tpu.core_type = #tpu.core_type<tc>, window_params = [{transform_indices = @transform_0, window_bounds = array<i64: 8, 8, 32>}, {transform_indices = @transform_1, window_bounds = array<i64: 8, 8, 32>}, {pipeline_mode = #tpu.pipeline_mode<synchronous>, transform_indices = @transform_2, window_bounds = array<i64: 1, 32>}, {transform_indices = @transform_3, window_bounds = array<i64: 8, 32>}, {transform_indices = @transform_4, window_bounds = array<i64: 8, 32>}]} {
    %c0 = arith.constant 0 : index
    %c0_0 = arith.constant 0 : index
    %c0_1 = arith.constant 0 : index
    %0 = vector.load %arg1[%c0, %c0_0, %c0_1] : memref<8x8x32xf32, #tpu.memory_space<vmem>>, vector<8x8x32xf32>
    %c0_2 = arith.constant 0 : index
    %c0_3 = arith.constant 0 : index
    %1 = vector.load %arg3[%c0_2, %c0_3] : memref<1x32xf32, #tpu.memory_space<vmem>>, vector<1x32xf32>
    %2 = vector.shape_cast %1 : vector<1x32xf32> to vector<32xf32>
    %3 = vector.shape_cast %2 : vector<32xf32> to vector<1x1x32xf32>
    %4 = vector.broadcast %3 : vector<1x1x32xf32> to vector<8x8x32xf32>
    %5 = arith.mulf %0, %4 : vector<8x8x32xf32>
    %cst = arith.constant dense<0.000000e+00> : vector<8x8xf32>
    %6 = vector.multi_reduction <add>, %5, %cst [2] : vector<8x8x32xf32> to vector<8x8xf32>
    %7 = vector.shape_cast %6 : vector<8x8xf32> to vector<8x8x1xf32>
    %8 = math.tanh %7 : vector<8x8x1xf32>
    %cst_4 = arith.constant dense<0xFF800000> : vector<8x1xf32>
    %9 = vector.multi_reduction <maximumf>, %8, %cst_4 [1] : vector<8x8x1xf32> to vector<8x1xf32>
    %10 = vector.shape_cast %9 : vector<8x1xf32> to vector<8x1x1xf32>
    %11 = vector.broadcast %10 : vector<8x1x1xf32> to vector<8x8x1xf32>
    %12 = arith.subf %8, %11 : vector<8x8x1xf32>
    %13 = math.exp %12 : vector<8x8x1xf32>
    %cst_5 = arith.constant dense<0.000000e+00> : vector<8x1xf32>
    %14 = vector.multi_reduction <add>, %13, %cst_5 [1] : vector<8x8x1xf32> to vector<8x1xf32>
    %15 = vector.shape_cast %14 : vector<8x1xf32> to vector<8x1x1xf32>
    %16 = tpu.reciprocal %15 {approx = true} : vector<8x1x1xf32> -> vector<8x1x1xf32>
    %17 = vector.broadcast %16 : vector<8x1x1xf32> to vector<8x8x1xf32>
    %18 = arith.mulf %13, %17 : vector<8x8x1xf32>
    %19 = vector.broadcast %18 : vector<8x8x1xf32> to vector<8x8x32xf32>
    %20 = arith.mulf %0, %19 : vector<8x8x32xf32>
    %cst_6 = arith.constant dense<0.000000e+00> : vector<8x32xf32>
    %21 = vector.multi_reduction <add>, %20, %cst_6 [1] : vector<8x8x32xf32> to vector<8x32xf32>
    %c0_7 = arith.constant 0 : index
    %c0_8 = arith.constant 0 : index
    %22 = vector.load %arg4[%c0_7, %c0_8] : memref<8x32xf32, #tpu.memory_space<vmem>>, vector<8x32xf32>
    tpu.vector_store %arg4[%c0_7, %c0_8], %21 {strides = array<i32>} : memref<8x32xf32, #tpu.memory_space<vmem>>, vector<8x32xf32>,
    %c0_9 = arith.constant 0 : index
    %c0_10 = arith.constant 0 : index
    %c0_11 = arith.constant 0 : index
    %23 = vector.load %arg2[%c0_9, %c0_10, %c0_11] : memref<8x8x32xf32, #tpu.memory_space<vmem>>, vector<8x8x32xf32>
    %24 = arith.addf %20, %23 : vector<8x8x32xf32>
    %cst_12 = arith.constant dense<0.000000e+00> : vector<8x32xf32>
    %25 = vector.multi_reduction <add>, %24, %cst_12 [1] : vector<8x8x32xf32> to vector<8x32xf32>
    %26 = vector.shape_cast %25 : vector<8x32xf32> to vector<8x1x32xf32>
    %cst_13 = arith.constant 8.000000e+00 : f32
    %27 = vector.broadcast %cst_13 : f32 to vector<8x1x32xf32>
    %28 = arith.divf %26, %27 : vector<8x1x32xf32>
    %29 = vector.broadcast %28 : vector<8x1x32xf32> to vector<8x8x32xf32>
    %30 = arith.subf %24, %29 : vector<8x8x32xf32>
    %31 = arith.mulf %30, %30 : vector<8x8x32xf32>
    %cst_14 = arith.constant dense<0.000000e+00> : vector<8x32xf32>
    %32 = vector.multi_reduction <add>, %31, %cst_14 [1] : vector<8x8x32xf32> to vector<8x32xf32>
    %cst_15 = arith.constant 7.000000e+00 : f32
    %33 = vector.broadcast %cst_15 : f32 to vector<8x32xf32>
    %34 = arith.divf %32, %33 : vector<8x32xf32>
    %35 = math.sqrt %34 : vector<8x32xf32>
    %c0_16 = arith.constant 0 : index
    %c0_17 = arith.constant 0 : index
    %36 = vector.load %arg5[%c0_16, %c0_17] : memref<8x32xf32, #tpu.memory_space<vmem>>, vector<8x32xf32>
    tpu.vector_store %arg5[%c0_16, %c0_17], %35 {strides = array<i32>} : memref<8x32xf32, #tpu.memory_space<vmem>>, vector<8x32xf32>,
    return
  }
  func.func @transform_0(%arg0: i32) -> (i32, i32, i32) {
    %c0_i32 = arith.constant 0 : i32
    %c0_i32_0 = arith.constant 0 : i32
    %c0_i32_1 = arith.constant 0 : i32
    return %arg0, %c0_i32, %c0_i32_0 : i32, i32, i32
  }
  func.func @transform_1(%arg0: i32) -> (i32, i32, i32) {
    %c0_i32 = arith.constant 0 : i32
    %c0_i32_0 = arith.constant 0 : i32
    %c0_i32_1 = arith.constant 0 : i32
    return %arg0, %c0_i32, %c0_i32_0 : i32, i32, i32
  }
  func.func @transform_2(%arg0: i32) -> (i32, i32) {
    %c0_i32 = arith.constant 0 : i32
    %c0_i32_0 = arith.constant 0 : i32
    %c0_i32_1 = arith.constant 0 : i32
    return %c0_i32, %c0_i32_0 : i32, i32
  }
  func.func @transform_3(%arg0: i32) -> (i32, i32) {
    %c0_i32 = arith.constant 0 : i32
    %c0_i32_0 = arith.constant 0 : i32
    return %arg0, %c0_i32 : i32, i32
  }
  func.func @transform_4(%arg0: i32) -> (i32, i32) {
    %c0_i32 = arith.constant 0 : i32
    %c0_i32_0 = arith.constant 0 : i32
    return %arg0, %c0_i32 : i32, i32
  }
}

</mosaic_0001>

<bundles_post_ra>
// kernel: tpu_custom_call.1
= control target key start
LH: loop header
LB: loop body
LE: loop exit
PB: predicated region body
PF: predicated region fallthrough
CT: control target
= control target key end

     0   :  { %10 = vsyncpa [#allocation3], 0  ;;  %s1731_s0 = inlined_call_operand.hbm [shape: f32[16,8,32], index: 0, kind: input, shape index: {}]   ;;  %s1732_s1 = inlined_call_operand.hbm [shape: f32[16,8,32], index: 1, kind: input, shape index: {}]   ;;  %s1733_s2 = inlined_call_operand.vmem [shape: f32[1,32], index: 2, kind: input, shape index: {}]   ;;  %s1734_s3 = inlined_call_operand.hbm [shape: f32[16,32], index: 3, kind: output, shape index: {0}]   ;;  %s1735_s4 = inlined_call_operand.hbm [shape: f32[16,32], index: 4, kind: output, shape index: {1}]  }
   0x1   :  { %12 = vsyncpa [#allocation3 + $0x1], 0 }
   0x2   :  { %13 = vsyncpa [#allocation6], 0 }
   0x3   :  { %15 = vsyncpa [#allocation6 + $0x1], 0 }
   0x4   :  { %16 = vsyncpa [#allocation4], 0 }
   0x5   :  { %18 = vsyncpa [#allocation4 + $0x1], 0 }
   0x6   :  { %19 = vsyncpa [#allocation9], 0 }
   0x7   :  { %21 = vsyncpa [#allocation9 + $0x1], 0  ;;  %s1273_s15 = smov 0   ;;  %s1275_s16 = smov 0  }
   0x8   :  { %s1277_s17 = smov 0   ;;  %s1279_s18 = smov 0  }
   0x9 LB: > { %s1294_s19 = sadd.s32 4294967295, %s1240_s18   ;;  %s941_s20 = sadd.s32 4294967294, %s1240_s18   ;;  %s1240_s18 = sphi %s1279_s18, %s1755_s18   ;;  %s1236_s17 = sphi %s1277_s17, %s1754_s17   ;;  %s1232_s16 = sphi %s1275_s16, %s1753_s16   ;;  %s1228_s15 = sphi %s1273_s15, %s1752_s15  }
   0xa   : > { %s1298_s21 = sadd.s32 1, %s1240_s18   ;;  %s34_s22 = sadd.s32 1, %s1236_s17 }
   0xb   : > { %s31_s23 = ssub.s32 %s1240_s18, %s1298_s21  ;;  %p41_p0 = scmp.ne.s32.totalorder %s1236_s17, %s1232_s16 }
   0xc   : > { %p32_p1 = scmp.eq.s32.totalorder %s31_s23, 0  ;;  %p42_p2 = scmp.eq.s32.totalorder %s1240_s18, 0 }
   0xd   : > { %p47_p3 = scmp.ne.s32.totalorder %s1232_s16, %s1228_s15  ;;  %p48_p4 = scmp.eq.s32.totalorder %s1294_s19, 0 }
   0xe   : > { %s1310_s24 = scalar_select %p32_p1, %s1236_s17, %s34_s22  }
   0xf   : > { %p1312_p5 = por %p42_p2, %p41_p0  ;;  %p1316_p6 = por %p48_p4, %p47_p3 }
  0x10   : > { %p118_p7 = scmp.eq.s32.totalorder %s1294_s19, 1  ;;  %p124_p8 = scmp.eq.s32.totalorder %s941_s20, 1 }
  0x11   : > { %s1741_s26 = scalar_select %p1316_p6, 1, 0 }
  0x12   : > { %p986_p10 = scmp.lt.s32.totalorder %s1240_s18, 2  ;;  %p1323_p11 = por %p118_p7, %p41_p0 }
  0x13   : > { %p1327_p12 = por %p124_p8, %p47_p3  ;;  %s1332_s29 = sand.u32 1, %s1236_s17  }
  0x14   : > { %s1742_s27 = scalar_select %p1323_p11, 1, 0 }
  0x15   : > { %s1743_s28 = scalar_select %p1327_p12, 1, 0 }
  0x16   : > { %s962_s30 = sshll.u32 %s1240_s18, 10  ;;  %s944_s5 = sshll.u32 %s1332_s29, 6 }
  0x17   : > { %s1341_s8 = scalar_lea.hbm %s1731_s0, %s962_s30  ;;  %s177_s9 = scalar_lea.vmem [#allocation2], %s944_s5 }
  0x18   : > { %s184_s10 = sshll.u32 %s177_s9, 4  ;;  %p1347_p13 = pnand %p986_p10, %p1312_p5  ;;  %s1351_s10 = int_to_ptr.vmem [resolvable:$true] %s184_s10 }
  0x19   : > { %s174_s12 = scalar_lea.sflag [#allocation3], %s1332_s29  ;;  %s1086_s13 = scalar_lea.hbm %s1341_s8, 1024 }
  0x1a   : > { %p1087_p0 = scmp.ne.s32.totalorder %s1341_s8, %s1086_s13  ;;  %p1088_p1 = pneg %p1347_p13 }
  0x1b   : > { %s1091_s22 = scalar_lea.hbm %s1731_s0, 2048  ;;  %p1092_p4 = scmp.lt.s32.totalorder %s1341_s8, %s1731_s0 }
  0x1c   : > { %p1089_p2 = pnand %p1088_p1, %p1087_p0  ;;  %p1093_p5 = scmp.lt.s32.totalorder %s1091_s22, %s1086_s13 }
  0x1e   : > { %p1090_p3 = pneg %p1089_p2  ;;  %p1094_p7 = por %p1093_p5, %p1092_p4 }
  0x20   : > { %p1095_p8 = pnand %p1094_p7, %p1090_p3 }
  0x22   : > { %1098 = shalt.err (!%p1095_p8)
}
  0x23   : > { %s1099_s6 = scalar_lea.vmem %s1351_s10, 1024  ;;  %s1242_s7 = smov [#allocation2]  }
  0x24   : > { %p1100_p10 = scmp.ne.s32.totalorder %s1351_s10, %s1099_s6  ;;  %s1104_s9 = sshll.u32 %s1242_s7, 4  ;;  %s1105_s9 = int_to_ptr.vmem [resolvable:$false] %s1104_s9 }
  0x25   : > { %s1106_s14 = scalar_lea.vmem %s1105_s9, 2048  ;;  %p1107_p9 = scmp.lt.s32.totalorder %s1351_s10, %s1105_s9 }
  0x26   : > { %p1102_p0 = pnand %p1100_p10, %p1088_p1  ;;  %p1108_p12 = scmp.lt.s32.totalorder %s1106_s14, %s1099_s6 }
  0x28   : > { %p1103_p2 = pneg %p1102_p0  ;;  %p1109_p11 = por %p1108_p12, %p1107_p9 }
  0x2a   : > { %p1110_p4 = pnand %p1109_p11, %p1103_p2 }
  0x2c   : > { %1113 = shalt.err (!%p1110_p4)
}
  0x2d   : > { %s1243_s13 = smov 128   ;;  %s1244_s20 = smov 8  }
  0x2e   : > { %975 = dma.hbm_to_vmem [thread:$0]  (!%p1347_p13), %s1341_s8, 1024, %s1351_s10, %s174_s12, %s1243_s13, %s1243_s13, %s1244_s20  }
  0x2f   : > { %p950_p9 = scmp.ge.s32.totalorder %s1240_s18, 1  ;;  %p213_p11 = scmp.lt.s32.totalorder %s1240_s18, 3 }
  0x30   : > { %s1394_s6 = scalar_lea.hbm %s1732_s1, %s962_s30  ;;  %s198_s7 = scalar_lea.vmem [#allocation5], %s944_s5 }
  0x31   : > { %p1385_p12 = pnand %p950_p9, %p213_p11  ;;  %s205_s9 = sshll.u32 %s198_s7, 4  ;;  %s1398_s9 = int_to_ptr.vmem [resolvable:$true] %s205_s9 }
  0x32   : > { %s195_s8 = scalar_lea.sflag [#allocation6], %s1332_s29  ;;  %s1114_s10 = scalar_lea.hbm %s1394_s6, 1024 }
  0x33   : > { %p1115_p3 = scmp.ne.s32.totalorder %s1394_s6, %s1114_s10  ;;  %s1119_s30 = scalar_lea.hbm %s1732_s1, 2048 }
  0x34   : > { %p1120_p8 = scmp.lt.s32.totalorder %s1394_s6, %s1732_s1  ;;  %p1121_p10 = scmp.lt.s32.totalorder %s1119_s30, %s1114_s10 }
  0x35   : > { %p1117_p5 = pnand %p1115_p3, %p1088_p1 }
  0x36   : > { %p1122_p0 = por %p1121_p10, %p1120_p8 }
  0x37   : > { %p1118_p7 = pneg %p1117_p5 }
  0x39   : > { %p1123_p2 = pnand %p1122_p0, %p1118_p7 }
  0x3b   : > { %1126 = shalt.err (!%p1123_p2)
}
  0x3c   : > { %s1127_s29 = scalar_lea.vmem %s1398_s9, 1024  ;;  %s1245_s5 = smov [#allocation5]  }
  0x3d   : > { %p1128_p4 = scmp.ne.s32.totalorder %s1398_s9, %s1127_s29  ;;  %s1132_s7 = sshll.u32 %s1245_s5, 4  ;;  %s1133_s7 = int_to_ptr.vmem [resolvable:$false] %s1132_s7 }
  0x3e   : > { %s1134_s12 = scalar_lea.vmem %s1133_s7, 2048  ;;  %p1135_p3 = scmp.lt.s32.totalorder %s1398_s9, %s1133_s7 }
  0x3f   : > { %p1130_p9 = pnand %p1128_p4, %p1088_p1  ;;  %p1136_p5 = scmp.lt.s32.totalorder %s1134_s12, %s1127_s29 }
  0x41   : > { %p1131_p11 = pneg %p1130_p9  ;;  %p1137_p6 = por %p1136_p5, %p1135_p3 }
  0x43   : > { %p1138_p8 = pnand %p1137_p6, %p1131_p11 }
  0x45   : > { %1141 = shalt.err (!%p1138_p8)
}
  0x46   : > { %978 = dma.hbm_to_vmem [thread:$0]  (!%p1347_p13), %s1394_s6, 1024, %s1398_s9, %s195_s8, %s1243_s13, %s1243_s13, %s1244_s20  }
  0x47   : > { %217 = sbr.rel (%p1385_p12) target bundleno = 402 (0x192), region = 32  ;;  %s1429_s10 = sand.u32 (!%p1385_p12), 1, %s1232_s16  }
  0x48   : > { %s951_s14 = sshll.u32 (!%p1385_p12), %s1429_s10, 6  ;;  %s220_s30 = scalar_lea.sflag (!%p1385_p12), [#allocation3], %s1429_s10 }
  0x49   : > { %s223_s23 = scalar_lea.vmem (!%p1385_p12), [#allocation2], %s951_s14  ;;  %p1746_p6 = scmp.ne.s32.totalorder (!%p1385_p12), %s1741_s26, 0 }
  0x4c   : > { %1211 = dma.done.wait (%p1746_p6), %s220_s30, 1024  }
  0x4d   : > { %1213 = vsyncadd (%p1746_p6), %s220_s30, 4294966272  ;;  %s229_s11 = scalar_lea.sflag [#allocation6], %s1429_s10  ;;  %s1438_s13 = scalar_lea.vmem [#allocation5], %s951_s14 }
  0x4e   : > { %1215 = dma.done.wait (%p1746_p6), %s229_s11, 1024  }
  0x4f   : > { %1217 = vsyncadd (%p1746_p6), %s229_s11, 4294966272  ;;  %v1444_v0 = vld [vmem:[%s223_s23 + $0x10] sm:$0xff]  ;;  %v955_v1 = vld [vmem:[%s1733_s2] ss:$0 sm:$0xff]  ;;  %vm1738_vm0 = vcmask 261120   ;;  %vm533_vm1 = vcmask 1041409  }
  0x50   : > { %v1449_v2 = vld [vmem:[%s223_s23] sm:$0xff]  ;;  %v286_v3 = vmul.f32 %v955_v1, %v1444_v0  ;;  %v1453_v5 = vld [vmem:[%s223_s23 + $0x18] sm:$0xff]  ;;  %v1455_v6 = vld [vmem:[%s223_s23 + $0x8] sm:$0xff]  ;;  %vm535_vm2 = vcmask 1042434   ;;  %vm537_vm3 = vcmask 1043459   ;;  %vm539_vm4 = vcmask 1044484  }
  0x51   : > { %v284_v4 = vmul.f32 %v955_v1, %v1449_v2  ;;  %v287_v7 = vmul.f32 %v955_v1, %v1453_v5  ;;  %v285_v8 = vmul.f32 %v955_v1, %v1455_v6  ;;  %v1459_v9 = vld [vmem:[%s223_s23 + $0x28] sm:$0xff]  ;;  %v1461_v10 = vld [vmem:[%s223_s23 + $0x20] sm:$0xff]  ;;  %v1469_v17 = vld [vmem:[%s223_s23 + $0x38] sm:$0xff]  ;;  %vm541_vm5 = vcmask 1045509   ;;  %s953_s26 = sshll.u32 %s1429_s10, 3  ;;  %s958_s6 = sshll.u32 %s1294_s19, 7 }
  0x52   : > { %v299_v11 = vsel %vm1738_vm0, %v286_v3, 0.0  ;;  %v289_v15 = vmul.f32 %v955_v1, %v1459_v9  ;;  %v288_v16 = vmul.f32 %v955_v1, %v1461_v10  ;;  %v1471_v18 = vld [vmem:[%s223_s23 + $0x30] sm:$0xff]  ;;  %v291_v21 = vmul.f32 %v955_v1, %v1469_v17  ;;  %s259_s9 = scalar_lea.vmem [#allocation7], %s953_s26  ;;  %s1596_s5 = scalar_lea.hbm %s1734_s3, %s958_s6 }
  0x53   : > { %v293_v12 = vsel %vm1738_vm0, %v284_v4, 0.0  ;;  %300 = vadd.xlane.f32.xlu1 %v299_v11  ;;  %v302_v13 = vsel %vm1738_vm0, %v287_v7, 0.0  ;;  %v296_v14 = vsel %vm1738_vm0, %v285_v8, 0.0  ;;  %v290_v22 = vmul.f32 %v955_v1, %v1471_v18  ;;  %s803_s8 = sshll.u32 %s259_s9, 4  ;;  %s785_s7 = scalar_lea.sflag [#allocation4], %s1429_s10  ;;  %s1598_s8 = int_to_ptr.vmem [resolvable:$true] %s803_s8 }
  0x54   : > { %294 = vadd.xlane.f32.xlu0 %v293_v12  ;;  %v308_v19 = vsel %vm1738_vm0, %v289_v15, 0.0  ;;  %v305_v20 = vsel %vm1738_vm0, %v288_v16, 0.0  ;;  %v314_v23 = vsel %vm1738_vm0, %v291_v21, 0.0  ;;  %vm543_vm6 = vcmask 1046534   ;;  %s1142_s12 = scalar_lea.vmem %s1598_s8, 128  ;;  %p1747_p1 = scmp.ne.s32.totalorder %s1742_s27, 0 }
  0x55   : > { %v311_v24 = vsel %vm1738_vm0, %v290_v22, 0.0  ;;  %vm1739_vm7 = vcmask 1047559   ;;  %p1143_p13 = scmp.ne.s32.totalorder %s1598_s8, %s1142_s12  ;;  %s1246_s14 = smov [#allocation7]  }
  0x56   : > { %s1146_s30 = sshll.u32 %s1246_s14, 4  ;;  %s1147_s30 = int_to_ptr.vmem [resolvable:$false] %s1146_s30 }
  0x57   : > { %303 = vadd.xlane.f32.xlu1 %v302_v13  ;;  %p1144_p12 = pnand %p1143_p13, %p1747_p1  ;;  %s1148_s23 = scalar_lea.vmem %s1147_s30, 256 }
  0x58   : > { %297 = vadd.xlane.f32.xlu0 %v296_v14  ;;  %p1149_p10 = scmp.lt.s32.totalorder %s1598_s8, %s1147_s30  ;;  %p1150_p0 = scmp.lt.s32.totalorder %s1148_s23, %s1142_s12 }
  0x59   : > { %p1145_p7 = pneg %p1144_p12 }
  0x5a   : > { %p1151_p2 = por %p1150_p0, %p1149_p10 }
  0x5b   : > { %309 = vadd.xlane.f32.xlu1 %v308_v19 }
  0x5c   : > { %306 = vadd.xlane.f32.xlu0 %v305_v20  ;;  %p1152_p4 = pnand %p1151_p2, %p1145_p7 }
  0x5f   : > { %315 = vadd.xlane.f32.xlu1 %v314_v23 }
  0x60   : > { %312 = vadd.xlane.f32.xlu0 %v311_v24 }
  0xdc   : > { %v301_v25 = vpop.xlane.xlu1 %300 }
  0xdd   : > { %v295_v26 = vpop.xlane.xlu0 %294  ;;  %1022 = vtanh.f32 %v301_v25 }
  0xde   : > { %1024 = vtanh.f32 %v295_v26 }
  0xe0   : > { %v304_v27 = vpop.xlane.xlu1 %303 }
  0xe1   : > { %v298_v28 = vpop.xlane.xlu0 %297  ;;  %1026 = vtanh.f32 %v304_v27 }
  0xe2   : > { %1028 = vtanh.f32 %v298_v28 }
  0xe4   : > { %v310_v29 = vpop.xlane.xlu1 %309 }
  0xe5   : > { %v307_v30 = vpop.xlane.xlu0 %306  ;;  %1030 = vtanh.f32 %v310_v29 }
  0xe6   : > { %1032 = vtanh.f32 %v307_v30 }
  0xe8   : > { %v316_v31 = vpop.xlane.xlu1 %315 }
  0xe9   : > { %v313_v32 = vpop.xlane.xlu0 %312  ;;  %1034 = vtanh.f32 %v316_v31 }
  0xea   : > { %v1023_v33 = vpop.eup %1022  ;;  %1036 = vtanh.f32 %v313_v32 }
  0xeb   : > { %v1025_v34 = vpop.eup %1024  ;;  %v337_v35 = vrot.slane %v1023_v33, 4 }
  0xec   : > { %v325_v36 = vrot.slane %v1025_v34, 4 }
  0xed   : > { %v338_v37 = vmax.f32 %v1023_v33, %v337_v35 }
  0xee   : > { %v1027_v38 = vpop.eup %1026  ;;  %v326_v39 = vmax.f32 %v1025_v34, %v325_v36 }
  0xef   : > { %v1029_v40 = vpop.eup %1028  ;;  %v339_v41 = vrot.slane %v338_v37, 2  ;;  %v343_v42 = vrot.slane %v1027_v38, 4 }
  0xf0   : > { %v327_v43 = vrot.slane %v326_v39, 2  ;;  %v331_v44 = vrot.slane %v1029_v40, 4 }
  0xf1   : > { %v340_v45 = vmax.f32 %v338_v37, %v339_v41  ;;  %v344_v46 = vmax.f32 %v1027_v38, %v343_v42 }
  0xf2   : > { %v1031_v47 = vpop.eup %1030  ;;  %v328_v48 = vmax.f32 %v326_v39, %v327_v43  ;;  %v332_v49 = vmax.f32 %v1029_v40, %v331_v44 }
  0xf3   : > { %v1033_v50 = vpop.eup %1032  ;;  %v341_v51 = vrot.slane %v340_v45, 1  ;;  %v345_v52 = vrot.slane %v344_v46, 2  ;;  %v355_v53 = vrot.slane %v1031_v47, 4 }
  0xf4   : > { %v329_v54 = vrot.slane %v328_v48, 1  ;;  %v333_v55 = vrot.slane %v332_v49, 2  ;;  %v349_v56 = vrot.slane %v1033_v50, 4 }
  0xf5   : > { %v342_v57 = vmax.f32 %v340_v45, %v341_v51  ;;  %v346_v58 = vmax.f32 %v344_v46, %v345_v52  ;;  %v356_v59 = vmax.f32 %v1031_v47, %v355_v53 }
  0xf6   : > { %v1035_v60 = vpop.eup %1034  ;;  %v330_v61 = vmax.f32 %v328_v48, %v329_v54  ;;  %v334_v62 = vmax.f32 %v332_v49, %v333_v55  ;;  %v350_v63 = vmax.f32 %v1033_v50, %v349_v56 }
  0xf7   : > { %v1037_v1 = vpop.eup %1036  ;;  %v375_v3 = vsub.f32 %v1023_v33, %v342_v57  ;;  %v347_v4 = vrot.slane %v346_v58, 1  ;;  %v357_v7 = vrot.slane %v356_v59, 2  ;;  %v367_v8 = vrot.slane %v1035_v60, 4 }
  0xf8   : > { %v373_v11 = vsub.f32 %v1025_v34, %v330_v61  ;;  %v335_v12 = vrot.slane %v334_v62, 1  ;;  %v351_v13 = vrot.slane %v350_v63, 2  ;;  %v361_v14 = vrot.slane %v1037_v1, 4 }
  0xf9   : > { %v385_v15 = vmul.f32 1.442695, %v375_v3  ;;  %v348_v16 = vmax.f32 %v346_v58, %v347_v4  ;;  %v358_v19 = vmax.f32 %v356_v59, %v357_v7  ;;  %v368_v20 = vmax.f32 %v1035_v60, %v367_v8 }
  0xfa   : > { %v381_v21 = vmul.f32 1.442695, %v373_v11  ;;  %v336_v22 = vmax.f32 %v334_v62, %v335_v12  ;;  %v352_v23 = vmax.f32 %v350_v63, %v351_v13  ;;  %v362_v24 = vmax.f32 %v1037_v1, %v361_v14 }
  0xfb   : > { %1038 = vpow2.f32 %v385_v15  ;;  %v376_v25 = vsub.f32 %v1027_v38, %v348_v16  ;;  %v359_v26 = vrot.slane %v358_v19, 1  ;;  %v369_v27 = vrot.slane %v368_v20, 2 }
  0xfc   : > { %1040 = vpow2.f32 %v381_v21  ;;  %v374_v28 = vsub.f32 %v1029_v40, %v336_v22  ;;  %v353_v29 = vrot.slane %v352_v23, 1  ;;  %v363_v30 = vrot.slane %v362_v24, 2 }
  0xfd   : > { %v387_v31 = vmul.f32 1.442695, %v376_v25  ;;  %v360_v32 = vmax.f32 %v358_v19, %v359_v26  ;;  %v370_v33 = vmax.f32 %v368_v20, %v369_v27 }
  0xfe   : > { %v383_v34 = vmul.f32 1.442695, %v374_v28  ;;  %v354_v35 = vmax.f32 %v352_v23, %v353_v29  ;;  %v364_v36 = vmax.f32 %v362_v24, %v363_v30 }
  0xff   : > { %1042 = vpow2.f32 %v387_v31  ;;  %v378_v37 = vsub.f32 %v1031_v47, %v360_v32  ;;  %v371_v39 = vrot.slane %v370_v33, 1 }
 0x100   : > { %1044 = vpow2.f32 %v383_v34  ;;  %v377_v41 = vsub.f32 %v1033_v50, %v354_v35  ;;  %v365_v42 = vrot.slane %v364_v36, 1 }
 0x101   : > { %v391_v43 = vmul.f32 1.442695, %v378_v37  ;;  %v372_v38 = vmax.f32 %v370_v33, %v371_v39 }
 0x102   : > { %v389_v44 = vmul.f32 1.442695, %v377_v41  ;;  %v366_v45 = vmax.f32 %v364_v36, %v365_v42 }
 0x103   : > { %1046 = vpow2.f32 %v391_v43  ;;  %v380_v40 = vsub.f32 %v1035_v60, %v372_v38 }
 0x104   : > { %1048 = vpow2.f32 %v389_v44  ;;  %v379_v46 = vsub.f32 %v1037_v1, %v366_v45 }
 0x105   : > { %v395_v48 = vmul.f32 1.442695, %v380_v40 }
 0x106   : > { %v393_v49 = vmul.f32 1.442695, %v379_v46 }
 0x107   : > { %1050 = vpow2.f32 %v395_v48 }
 0x108   : > { %v1479_v51 = vpop.eup %1038  ;;  %1052 = vpow2.f32 %v393_v49 }
 0x109   : > { %v1481_v52 = vpop.eup %1040  ;;  %v409_v47 = vrot.slane %v1479_v51, 4 }
 0x10a   : > { %v397_v50 = vrot.slane %v1481_v52, 4 }
 0x10b   : > { %v410_v53 = vadd.f32 %v1479_v51, %v409_v47 }
 0x10c   : > { %v1486_v54 = vpop.eup %1042  ;;  %v398_v55 = vadd.f32 %v1481_v52, %v397_v50 }
 0x10d   : > { %v1489_v56 = vpop.eup %1044  ;;  %v411_v57 = vrot.slane %v410_v53, 2  ;;  %v415_v58 = vrot.slane %v1486_v54, 4 }
 0x10e   : > { %v399_v59 = vrot.slane %v398_v55, 2  ;;  %v403_v60 = vrot.slane %v1489_v56, 4 }
 0x10f   : > { %v412_v61 = vadd.f32 %v411_v57, %v410_v53  ;;  %v416_v62 = vadd.f32 %v1486_v54, %v415_v58  ;;  %v551_v57 = vld [vmem:[%s1438_s13 + $0x10] sm:$0xff] }
 0x110   : > { %v1494_v63 = vpop.eup %1046  ;;  %v400_v1 = vadd.f32 %v399_v59, %v398_v55  ;;  %v404_v3 = vadd.f32 %v1489_v56, %v403_v60  ;;  %v549_v59 = vld [vmem:[%s1438_s13] sm:$0xff] }
 0x111   : > { %v1497_v4 = vpop.eup %1048  ;;  %v413_v7 = vrot.slane %v412_v61, 1  ;;  %v417_v8 = vrot.slane %v416_v62, 2  ;;  %v427_v11 = vrot.slane %v1494_v63, 4 }
 0x112   : > { %v401_v12 = vrot.slane %v400_v1, 1  ;;  %v405_v13 = vrot.slane %v404_v3, 2  ;;  %v421_v14 = vrot.slane %v1497_v4, 4 }
 0x113   : > { %v414_v15 = vadd.f32 %v413_v7, %v412_v61  ;;  %v418_v16 = vadd.f32 %v417_v8, %v416_v62  ;;  %v428_v19 = vadd.f32 %v1494_v63, %v427_v11  ;;  %v552_v11 = vld [vmem:[%s1438_s13 + $0x18] sm:$0xff] }
 0x114   : > { %v1502_v20 = vpop.eup %1050  ;;  %v402_v21 = vadd.f32 %v401_v12, %v400_v1  ;;  %v406_v22 = vadd.f32 %v405_v13, %v404_v3  ;;  %v422_v23 = vadd.f32 %v1497_v4, %v421_v14 }
 0x115   : > { %v1505_v24 = vpop.eup %1052  ;;  %v419_v25 = vrot.slane %v418_v16, 1  ;;  %v429_v26 = vrot.slane %v428_v19, 2  ;;  %v439_v27 = vrot.slane %v1502_v20, 4  ;;  %1054 = vrcp.f32 %v414_v15 }
 0x116   : > { %v407_v28 = vrot.slane %v406_v22, 1  ;;  %v423_v29 = vrot.slane %v422_v23, 2  ;;  %v433_v30 = vrot.slane %v1505_v24, 4  ;;  %1056 = vrcp.f32 %v402_v21 }
 0x117   : > { %v420_v31 = vadd.f32 %v419_v25, %v418_v16  ;;  %v430_v32 = vadd.f32 %v429_v26, %v428_v19  ;;  %v440_v33 = vadd.f32 %v1502_v20, %v439_v27  ;;  %v550_v16 = vld [vmem:[%s1438_s13 + $0x8] sm:$0xff] }
 0x118   : > { %v408_v34 = vadd.f32 %v407_v28, %v406_v22  ;;  %v424_v35 = vadd.f32 %v423_v29, %v422_v23  ;;  %v434_v36 = vadd.f32 %v1505_v24, %v433_v30 }
 0x119   : > { %v431_v37 = vrot.slane %v430_v32, 1  ;;  %v441_v39 = vrot.slane %v440_v33, 2  ;;  %1058 = vrcp.f32 %v420_v31 }
 0x11a   : > { %v425_v41 = vrot.slane %v424_v35, 1  ;;  %v435_v42 = vrot.slane %v434_v36, 2  ;;  %1060 = vrcp.f32 %v408_v34 }
 0x11b   : > { %v432_v43 = vadd.f32 %v431_v37, %v430_v32  ;;  %v442_v38 = vadd.f32 %v441_v39, %v440_v33 }
 0x11c   : > { %v426_v44 = vadd.f32 %v425_v41, %v424_v35  ;;  %v436_v45 = vadd.f32 %v435_v42, %v434_v36 }
 0x11d   : > { %v443_v40 = vrot.slane %v442_v38, 1  ;;  %1062 = vrcp.f32 %v432_v43 }
 0x11e   : > { %v437_v46 = vrot.slane %v436_v45, 1  ;;  %1064 = vrcp.f32 %v426_v44 }
 0x11f   : > { %v444_v48 = vadd.f32 %v443_v40, %v442_v38 }
 0x120   : > { %v438_v49 = vadd.f32 %v437_v46, %v436_v45 }
 0x121   : > { %1066 = vrcp.f32 %v444_v48 }
 0x122   : > { %v1055_v47 = vpop.eup %1054  ;;  %1068 = vrcp.f32 %v438_v49 }
 0x123   : > { %v1057_v50 = vpop.eup %1056  ;;  %v455_v53 = vmul.f32 %v1055_v47, %v1479_v51 }
 0x124   : > { %v453_v55 = vmul.f32 %v1057_v50, %v1481_v52 }
 0x125   : > { %v463_v58 = vmul.f32 %v455_v53, %v1444_v0 }
 0x126   : > { %v1059_v60 = vpop.eup %1058  ;;  %v461_v61 = vmul.f32 %v453_v55, %v1449_v2 }
 0x127   : > { %v1061_v62 = vpop.eup %1060  ;;  %v456_v1 = vmul.f32 %v1059_v60, %v1486_v54  ;;  %v483_v3 = vsel %vm1738_vm0, %v463_v58, 0.0  ;;  %v1519_v7 = vadd.f32 %v551_v57, %v463_v58  ;;  %v554_v58 = vld [vmem:[%s1438_s13 + $0x28] sm:$0xff] }
 0x128   : > { %v454_v8 = vmul.f32 %v1061_v62, %v1489_v56  ;;  %v469_v51 = vsel %vm1738_vm0, %v461_v61, 0.0  ;;  %v484_v52 = vrot.slane %v483_v3, 4  ;;  %v1524_v12 = vadd.f32 %v549_v59, %v461_v61 }
 0x129   : > { %v464_v0 = vmul.f32 %v456_v1, %v1453_v5  ;;  %v470_v13 = vrot.slane %v469_v51, 4  ;;  %v1529_v2 = vsel %vm1738_vm0, %v1519_v7, 0.0 }
 0x12a   : > { %v1063_v54 = vpop.eup %1062  ;;  %v462_v14 = vmul.f32 %v454_v8, %v1455_v6  ;;  %v485_v15 = vadd.f32 %v484_v52, %v483_v3  ;;  %v1535_v56 = vsel %vm1738_vm0, %v1524_v12, 0.0  ;;  %v580_v19 = vrot.slane %v1529_v2, 4  ;;  %v556_v8 = vld [vmem:[%s1438_s13 + $0x38] sm:$0xff] }
 0x12b   : > { %v1065_v21 = vpop.eup %1064  ;;  %v458_v22 = vmul.f32 %v1063_v54, %v1494_v63  ;;  %v471_v5 = vadd.f32 %v470_v13, %v469_v51  ;;  %v490_v23 = vsel %vm1738_vm0, %v464_v0, 0.0  ;;  %v1540_v25 = vadd.f32 %v552_v11, %v464_v0 }
 0x12c   : > { %v457_v26 = vmul.f32 %v1065_v21, %v1497_v4  ;;  %v476_v6 = vsel %vm1738_vm0, %v462_v14, 0.0  ;;  %v486_v27 = vrot.slane %v485_v15, 2  ;;  %v491_v28 = vrot.slane %v490_v23, 4 }
 0x12d   : > { %v466_v29 = vmul.f32 %v458_v22, %v1459_v9  ;;  %v472_v30 = vrot.slane %v471_v5, 2  ;;  %v477_v31 = vrot.slane %v476_v6, 4  ;;  %v1545_v32 = vadd.f32 %v550_v16, %v462_v14 }
 0x12e   : > { %v1067_v33 = vpop.eup %1066  ;;  %v465_v63 = vmul.f32 %v457_v26, %v1461_v10  ;;  %v487_v34 = vadd.f32 %v486_v27, %v485_v15  ;;  %v492_v35 = vadd.f32 %v491_v28, %v490_v23  ;;  %v566_v36 = vrot.slane %v1535_v56, 4 }
 0x12f   : > { %v1069_v37 = vpop.eup %1068  ;;  %v460_v4 = vmul.f32 %v1067_v33, %v1502_v20  ;;  %v473_v39 = vadd.f32 %v472_v30, %v471_v5  ;;  %v478_v41 = vadd.f32 %v477_v31, %v476_v6  ;;  %v504_v42 = vsel %vm1738_vm0, %v466_v29, 0.0 }
 0x130   : > { %v459_v9 = vmul.f32 %v1069_v37, %v1505_v24  ;;  %v488_v43 = vrot.slane %v487_v34, 1  ;;  %v493_v38 = vrot.slane %v492_v35, 2  ;;  %v497_v10 = vsel %vm1738_vm0, %v465_v63, 0.0  ;;  %v553_v24 = vld [vmem:[%s1438_s13 + $0x20] sm:$0xff] }
 0x131   : > { %v468_v44 = vmul.f32 %v460_v4, %v1469_v17  ;;  %v474_v45 = vrot.slane %v473_v39, 1  ;;  %v479_v40 = vrot.slane %v478_v41, 2  ;;  %v498_v46 = vrot.slane %v497_v10, 4 }
 0x132   : > { %v467_v20 = vmul.f32 %v459_v9, %v1471_v18  ;;  %v489_v48 = vadd.f32 %v488_v43, %v487_v34  ;;  %v494_v49 = vadd.f32 %v493_v38, %v492_v35  ;;  %v505_v47 = vrot.slane %v504_v42, 4  ;;  %v555_v18 = vld [vmem:[%s1438_s13 + $0x30] sm:$0xff] }
 0x133   : > { %v475_v50 = vadd.f32 %v474_v45, %v473_v39  ;;  %v480_v53 = vadd.f32 %v479_v40, %v478_v41  ;;  %v499_v55 = vadd.f32 %v498_v46, %v497_v10  ;;  %v518_v57 = vsel %vm1738_vm0, %v468_v44, 0.0 }
 0x134   : > { %v495_v17 = vrot.slane %v494_v49, 1  ;;  %v506_v59 = vadd.f32 %v505_v47, %v504_v42  ;;  %v511_v60 = vsel %vm1738_vm0, %v467_v20, 0.0  ;;  %v519_v61 = vrot.slane %v518_v57, 4 }
 0x135   : > { %v481_v62 = vrot.slane %v480_v53, 1  ;;  %v500_v1 = vrot.slane %v499_v55, 2  ;;  %v512_v3 = vrot.slane %v511_v60, 4  ;;  %v1561_v51 = vadd.f32 %v553_v24, %v465_v63 }
 0x136   : > { %v496_v52 = vadd.f32 %v495_v17, %v494_v49  ;;  %v507_v11 = vrot.slane %v506_v59, 2  ;;  %v520_v0 = vadd.f32 %v519_v61, %v518_v57  ;;  %v1563_v13 = vadd.f32 %v554_v58, %v466_v29 }
 0x137   : > { %v482_v54 = vadd.f32 %v481_v62, %v480_v53  ;;  %v501_v14 = vadd.f32 %v500_v1, %v499_v55  ;;  %v513_v15 = vadd.f32 %v512_v3, %v511_v60  ;;  %v1565_v16 = vadd.f32 %v555_v18, %v467_v20 }
 0x138   : > { %v508_v21 = vadd.f32 %v507_v11, %v506_v59  ;;  %v521_v22 = vrot.slane %v520_v0, 2  ;;  %v1567_v5 = vadd.f32 %v556_v8, %v468_v44  ;;  %v567_v23 = vadd.f32 %v566_v36, %v1535_v56 }
 0x139   : > { %v502_v26 = vrot.slane %v501_v14, 1  ;;  %v514_v6 = vrot.slane %v513_v15, 2  ;;  %v534_v27 = vsel %vm533_vm1, %v482_v54, %v475_v50  ;;  %v572_v28 = vsel %vm1738_vm0, %v1545_v32, 0.0 }
 0x13a   : > { %v509_v29 = vrot.slane %v508_v21, 1  ;;  %v522_v30 = vadd.f32 %v521_v22, %v520_v0  ;;  %v536_v31 = vsel %vm535_vm2, %v489_v48, %v534_v27  ;;  %v568_v33 = vrot.slane %v567_v23, 2 }
 0x13b   : > { %v503_v63 = vadd.f32 %v502_v26, %v501_v14  ;;  %v515_v34 = vadd.f32 %v514_v6, %v513_v15  ;;  %v538_v35 = vsel %vm537_vm3, %v496_v52, %v536_v31  ;;  %v573_v56 = vrot.slane %v572_v28, 4 }
 0x13c   : > { %v510_v36 = vadd.f32 %v509_v29, %v508_v21  ;;  %v523_v37 = vrot.slane %v522_v30, 1  ;;  %v569_v4 = vadd.f32 %v568_v33, %v567_v23  ;;  %v581_v39 = vadd.f32 %v580_v19, %v1529_v2 }
 0x13d   : > { %v516_v41 = vrot.slane %v515_v34, 1  ;;  %v540_v42 = vsel %vm539_vm4, %v503_v63, %v538_v35  ;;  %v574_v9 = vadd.f32 %v573_v56, %v572_v28  ;;  %v586_v43 = vsel %vm1738_vm0, %v1540_v25, 0.0 }
 0x13e   : > { %v524_v38 = vadd.f32 %v523_v37, %v522_v30  ;;  %v542_v10 = vsel %vm541_vm5, %v510_v36, %v540_v42  ;;  %v570_v44 = vrot.slane %v569_v4, 1  ;;  %v582_v45 = vrot.slane %v581_v39, 2 }
 0x13f   : > { %v517_v40 = vadd.f32 %v516_v41, %v515_v34  ;;  %v575_v46 = vrot.slane %v574_v9, 2  ;;  %v587_v2 = vrot.slane %v586_v43, 4  ;;  %v593_v19 = vsel %vm1738_vm0, %v1561_v51, 0.0 }
 0x140   : > { %v571_v20 = vadd.f32 %v570_v44, %v569_v4  ;;  %v583_v48 = vadd.f32 %v582_v45, %v581_v39  ;;  %v594_v49 = vrot.slane %v593_v19, 4  ;;  %v600_v47 = vsel %vm1738_vm0, %v1563_v13, 0.0 }
 0x141   : > { %v544_v24 = vsel %vm543_vm6, %v517_v40, %v542_v10  ;;  %v576_v50 = vadd.f32 %v575_v46, %v574_v9  ;;  %v588_v53 = vadd.f32 %v587_v2, %v586_v43  ;;  %v601_v55 = vrot.slane %v600_v47, 4 }
 0x142   : > { %v546_v57 = vsel %vm1739_vm7, %v524_v38, %v544_v24  ;;  %v584_v58 = vrot.slane %v583_v48, 1  ;;  %v595_v17 = vadd.f32 %v594_v49, %v593_v19  ;;  %v607_v59 = vsel %vm1738_vm0, %v1565_v16, 0.0 }
 0x143   : > { %548 = vst.msk [vmem:[%s259_s9] sm:$0xff] %vm1738_vm0, %v546_v57  ;;  %v577_v60 = vrot.slane %v576_v50, 1  ;;  %v589_v61 = vrot.slane %v588_v53, 2  ;;  %v602_v18 = vadd.f32 %v601_v55, %v600_v47  ;;  %v608_v62 = vrot.slane %v607_v59, 4 }
 0x144   : > { %v585_v1 = vadd.f32 %v584_v58, %v583_v48  ;;  %v596_v3 = vrot.slane %v595_v17, 2  ;;  %v614_v8 = vsel %vm1738_vm0, %v1567_v5, 0.0  ;;  %v622_v52 = vmul.f32 0.125, %v571_v20 }
 0x145   : > { %1155 = shalt.err (!%p1152_p4)
}
 0x146   : > { %s1156_s11 = scalar_lea.hbm %s1596_s5, 128  ;;  %s1160_s22 = scalar_lea.hbm %s1734_s3, 256 }
 0x147   : > { %p1157_p9 = scmp.ne.s32.totalorder %s1596_s5, %s1156_s11  ;;  %p1161_p5 = scmp.lt.s32.totalorder %s1596_s5, %s1734_s3 }
 0x148   : > { %p1162_p8 = scmp.lt.s32.totalorder %s1160_s22, %s1156_s11 }
 0x149   : > { %p1158_p11 = pnand %p1157_p9, %p1747_p1 }
 0x14a   : > { %p1163_p6 = por %p1162_p8, %p1161_p5 }
 0x14b   : > { %p1159_p3 = pneg %p1158_p11 }
 0x14d   : > { %p1164_p13 = pnand %p1163_p6, %p1159_p3 }
 0x14f   : > { %1167 = shalt.err (!%p1164_p13)
}
 0x150   : > { %968 = dma.vmem_to_hbm [thread:$0]  (%p1747_p1), %s1598_s8, 128, %s1596_s5, %s785_s7   ;;  %v578_v11 = vadd.f32 %v577_v60, %v576_v50  ;;  %v590_v0 = vadd.f32 %v589_v61, %v588_v53  ;;  %v603_v54 = vrot.slane %v602_v18, 2  ;;  %v609_v14 = vadd.f32 %v608_v62, %v607_v59 }
 0x151   : > { %v597_v15 = vadd.f32 %v596_v3, %v595_v17  ;;  %v615_v21 = vrot.slane %v614_v8, 4  ;;  %v624_v22 = vmul.f32 0.125, %v585_v1  ;;  %v630_v23 = vsub.f32 %v1524_v12, %v622_v52  ;;  %s266_s8 = scalar_lea.vmem [#allocation8], %s953_s26  ;;  %s1692_s7 = scalar_lea.hbm %s1735_s4, %s958_s6 }
 0x152   : > { %v591_v26 = vrot.slane %v590_v0, 1  ;;  %v604_v6 = vadd.f32 %v603_v54, %v602_v18  ;;  %v610_v27 = vrot.slane %v609_v14, 2  ;;  %v623_v28 = vmul.f32 0.125, %v578_v11  ;;  %s816_s29 = sshll.u32 %s266_s8, 4  ;;  %s790_s12 = scalar_lea.sflag [#allocation9], %s1429_s10  ;;  %s817_s29 = int_to_ptr.vmem [resolvable:$true] %s816_s29 }
 0x153   : > { %v598_v29 = vrot.slane %v597_v15, 1  ;;  %v616_v30 = vadd.f32 %v615_v21, %v614_v8  ;;  %v632_v31 = vsub.f32 %v1519_v7, %v624_v22  ;;  %v638_v33 = vmul.f32 %v630_v23, %v630_v23  ;;  %s1168_s14 = scalar_lea.vmem %s817_s29, 128  ;;  %s1247_s30 = smov [#allocation8]  }
 0x154   : > { %v592_v63 = vadd.f32 %v591_v26, %v590_v0  ;;  %v605_v34 = vrot.slane %v604_v6, 1  ;;  %v611_v35 = vadd.f32 %v610_v27, %v609_v14  ;;  %v631_v56 = vsub.f32 %v1545_v32, %v623_v28  ;;  %p1169_p12 = scmp.ne.s32.totalorder %s817_s29, %s1168_s14  ;;  %s1172_s23 = sshll.u32 %s1247_s30, 4  ;;  %s1173_s23 = int_to_ptr.vmem [resolvable:$false] %s1172_s23 }
 0x155   : > { %v599_v36 = vadd.f32 %v598_v29, %v597_v15  ;;  %v617_v37 = vrot.slane %v616_v30, 2  ;;  %v640_v4 = vmul.f32 %v632_v31, %v632_v31  ;;  %v646_v39 = vsel %vm1738_vm0, %v638_v33, 0.0  ;;  %s1174_s19 = scalar_lea.vmem %s1173_s23, 256  ;;  %p1175_p0 = scmp.lt.s32.totalorder %s817_s29, %s1173_s23 }
 0x156   : > { %v606_v12 = vadd.f32 %v605_v34, %v604_v6  ;;  %v612_v41 = vrot.slane %v611_v35, 1  ;;  %v625_v42 = vmul.f32 0.125, %v592_v63  ;;  %v639_v9 = vmul.f32 %v631_v56, %v631_v56  ;;  %p1170_p7 = pnand %p1169_p12, %p1747_p1  ;;  %p1176_p2 = scmp.lt.s32.totalorder %s1174_s19, %s1168_s14 }
 0x157   : > { %v618_v43 = vadd.f32 %v617_v37, %v616_v30  ;;  %v626_v38 = vmul.f32 0.125, %v599_v36  ;;  %v647_v10 = vrot.slane %v646_v39, 4  ;;  %v660_v7 = vsel %vm1738_vm0, %v640_v4, 0.0 }
 0x158   : > { %v613_v44 = vadd.f32 %v612_v41, %v611_v35  ;;  %v627_v45 = vmul.f32 0.125, %v606_v12  ;;  %v633_v40 = vsub.f32 %v1540_v25, %v625_v42  ;;  %v653_v32 = vsel %vm1738_vm0, %v639_v9, 0.0  ;;  %p1171_p10 = pneg %p1170_p7  ;;  %p1177_p4 = por %p1176_p2, %p1175_p0 }
 0x159   : > { %v619_v46 = vrot.slane %v618_v43, 1  ;;  %v634_v2 = vsub.f32 %v1561_v51, %v626_v38  ;;  %v648_v19 = vadd.f32 %v647_v10, %v646_v39  ;;  %v654_v20 = vrot.slane %v653_v32, 4 }
 0x15a   : > { %v628_v48 = vmul.f32 0.125, %v613_v44  ;;  %v635_v49 = vsub.f32 %v1563_v13, %v627_v45  ;;  %v641_v47 = vmul.f32 %v633_v40, %v633_v40  ;;  %v661_v24 = vrot.slane %v660_v7, 4  ;;  %p1178_p9 = pnand %p1177_p4, %p1171_p10 }
 0x15b   : > { %v620_v50 = vadd.f32 %v619_v46, %v618_v43  ;;  %v642_v53 = vmul.f32 %v634_v2, %v634_v2  ;;  %v649_v55 = vrot.slane %v648_v19, 2  ;;  %v655_v57 = vadd.f32 %v654_v20, %v653_v32 }
 0x15c   : > { %v636_v58 = vsub.f32 %v1565_v16, %v628_v48  ;;  %v643_v17 = vmul.f32 %v635_v49, %v635_v49  ;;  %v662_v25 = vadd.f32 %v661_v24, %v660_v7  ;;  %v667_v59 = vsel %vm1738_vm0, %v641_v47, 0.0 }
 0x15d   : > { %v629_v60 = vmul.f32 0.125, %v620_v50  ;;  %v650_v61 = vadd.f32 %v649_v55, %v648_v19  ;;  %v656_v51 = vrot.slane %v655_v57, 2  ;;  %v668_v18 = vrot.slane %v667_v59, 4 }
 0x15e   : > { %v644_v62 = vmul.f32 %v636_v58, %v636_v58  ;;  %v663_v1 = vrot.slane %v662_v25, 2  ;;  %v674_v13 = vsel %vm1738_vm0, %v642_v53, 0.0  ;;  %v681_v3 = vsel %vm1738_vm0, %v643_v17, 0.0 }
 0x15f   : > { %v637_v8 = vsub.f32 %v1567_v5, %v629_v60  ;;  %v651_v52 = vrot.slane %v650_v61, 1  ;;  %v657_v11 = vadd.f32 %v656_v51, %v655_v57  ;;  %v669_v0 = vadd.f32 %v668_v18, %v667_v59 }
 0x160   : > { %v664_v16 = vadd.f32 %v663_v1, %v662_v25  ;;  %v675_v54 = vrot.slane %v674_v13, 4  ;;  %v682_v14 = vrot.slane %v681_v3, 4  ;;  %v688_v15 = vsel %vm1738_vm0, %v644_v62, 0.0 }
 0x161   : > { %v645_v21 = vmul.f32 %v637_v8, %v637_v8  ;;  %v658_v22 = vrot.slane %v657_v11, 1  ;;  %v670_v23 = vrot.slane %v669_v0, 2  ;;  %v689_v26 = vrot.slane %v688_v15, 4 }
 0x162   : > { %v665_v6 = vrot.slane %v664_v16, 1  ;;  %v676_v27 = vadd.f32 %v675_v54, %v674_v13  ;;  %v683_v28 = vadd.f32 %v682_v14, %v681_v3  ;;  %v652_v29 = vadd.f32 %v651_v52, %v650_v61 }
 0x163   : > { %v671_v30 = vadd.f32 %v670_v23, %v669_v0  ;;  %v690_v31 = vadd.f32 %v689_v26, %v688_v15  ;;  %v695_v5 = vsel %vm1738_vm0, %v645_v21, 0.0  ;;  %v659_v33 = vadd.f32 %v658_v22, %v657_v11 }
 0x164   : > { %v677_v63 = vrot.slane %v676_v27, 2  ;;  %v684_v34 = vrot.slane %v683_v28, 2  ;;  %v696_v35 = vrot.slane %v695_v5, 4  ;;  %v666_v56 = vadd.f32 %v665_v6, %v664_v16 }
 0x165   : > { %v672_v36 = vrot.slane %v671_v30, 1  ;;  %v691_v37 = vrot.slane %v690_v31, 2  ;;  %v703_v4 = vmul.f32 0.14285715, %v652_v29  ;;  %v704_v39 = vmul.f32 0.14285715, %v659_v33 }
 0x166   : > { %v678_v12 = vadd.f32 %v677_v63, %v676_v27  ;;  %v685_v41 = vadd.f32 %v684_v34, %v683_v28  ;;  %v697_v42 = vadd.f32 %v696_v35, %v695_v5  ;;  %v705_v38 = vmul.f32 0.14285715, %v666_v56 }
 0x167   : > { %v692_v9 = vadd.f32 %v691_v37, %v690_v31  ;;  %v673_v43 = vadd.f32 %v672_v36, %v671_v30  ;;  %1070 = vrsqrt.f32 %v703_v4  ;;  %vm713_vm8 = vcmp.eq.f32.partialorder %v703_v4, inf }
 0x168   : > { %v679_v10 = vrot.slane %v678_v12, 1  ;;  %v686_v7 = vrot.slane %v685_v41, 1  ;;  %v698_v44 = vrot.slane %v697_v42, 2  ;;  %1072 = vrsqrt.f32 %v704_v39 }
 0x169   : > { %v693_v45 = vrot.slane %v692_v9, 1  ;;  %v706_v40 = vmul.f32 0.14285715, %v673_v43  ;;  %1074 = vrsqrt.f32 %v705_v38  ;;  %vm715_vm9 = vcmp.eq.f32.partialorder %v703_v4, 0.0 }
 0x16a   : > { %v699_v32 = vadd.f32 %v698_v44, %v697_v42  ;;  %v680_v46 = vadd.f32 %v679_v10, %v678_v12  ;;  %v687_v2 = vadd.f32 %v686_v7, %v685_v41  ;;  %v716_v58 = vand.u32 2147483648, %v703_v4 }
 0x16b   : > { %v694_v19 = vadd.f32 %v693_v45, %v692_v9  ;;  %1076 = vrsqrt.f32 %v706_v40  ;;  %vm720_vm10 = vcmp.eq.f32.partialorder %v704_v39, inf  ;;  %vm722_vm11 = vcmp.eq.f32.partialorder %v704_v39, 0.0 }
 0x16c   : > { %v700_v20 = vrot.slane %v699_v32, 1  ;;  %v707_v48 = vmul.f32 0.14285715, %v680_v46  ;;  %v1643_v49 = vmul.f32 0.14285715, %v687_v2  ;;  %v723_v60 = vand.u32 2147483648, %v704_v39 }
 0x16d   : > { %v1645_v47 = vmul.f32 0.14285715, %v694_v19  ;;  %vm727_vm12 = vcmp.eq.f32.partialorder %v705_v38, inf  ;;  %vm729_vm13 = vcmp.eq.f32.partialorder %v705_v38, 0.0  ;;  %v730_v61 = vand.u32 2147483648, %v705_v38 }
 0x16e   : > { %v701_v24 = vadd.f32 %v700_v20, %v699_v32  ;;  %1078 = vrsqrt.f32 %v707_v48  ;;  %vm734_vm14 = vcmp.eq.f32.partialorder %v706_v40, inf  ;;  %vm736_vm15 = vcmp.eq.f32.partialorder %v706_v40, 0.0 }
 0x16f   : > { %1080 = vrsqrt.f32 %v1643_v49  ;;  %v737_v3 = vand.u32 2147483648, %v706_v40  ;;  %vm741_vm0 = vcmp.eq.f32.partialorder %v707_v48, inf  ;;  %v744_v54 = vand.u32 2147483648, %v707_v48 }
 0x170   : > { %v1647_v50 = vmul.f32 0.14285715, %v701_v24  ;;  %1082 = vrsqrt.f32 %v1645_v47  ;;  %vm750_vm7 = vcmp.eq.f32.partialorder %v1643_v49, 0.0  ;;  %v751_v22 = vand.u32 2147483648, %v1643_v49 }
 0x171   : > { %v758_v31 = vand.u32 2147483648, %v1645_v47 }
 0x172   : > { %1084 = vrsqrt.f32 %v1647_v50  ;;  %v765_v36 = vand.u32 2147483648, %v1647_v50 }
 0x174   : > { %v1071_v53 = vpop.eup %1070 }
 0x175   : > { %v712_v55 = vmul.f32 %v1071_v53, %v703_v4  ;;  %v1073_v57 = vpop.eup %1072 }
 0x176   : > { %v719_v25 = vmul.f32 %v1073_v57, %v704_v39  ;;  %v1075_v59 = vpop.eup %1074 }
 0x177   : > { %v714_v17 = vsel %vm713_vm8, %v703_v4, %v712_v55  ;;  %v726_v18 = vmul.f32 %v1075_v59, %v705_v38  ;;  %vm743_vm8 = vcmp.eq.f32.partialorder %v707_v48, 0.0 }
 0x178   : > { %v721_v51 = vsel %vm720_vm10, %v704_v39, %v719_v25  ;;  %v1077_v62 = vpop.eup %1076  ;;  %v717_v1 = vsel %vm715_vm9, %v716_v58, %v714_v17  ;;  %vm748_vm10 = vcmp.eq.f32.partialorder %v1643_v49, inf  ;;  %vm757_vm9 = vcmp.eq.f32.partialorder %v1645_v47, 0.0 }
 0x179   : > { %v724_v13 = vsel %vm722_vm11, %v723_v60, %v721_v51  ;;  %v728_v8 = vsel %vm727_vm12, %v705_v38, %v726_v18  ;;  %v733_v52 = vmul.f32 %v1077_v62, %v706_v40 }
 0x17a   : > { %v775_v11 = vsel %vm533_vm1, %v724_v13, %v717_v1  ;;  %v731_v16 = vsel %vm729_vm13, %v730_v61, %v728_v8  ;;  %vm755_vm1 = vcmp.eq.f32.partialorder %v1645_v47, inf }
 0x17b   : > { %v1079_v0 = vpop.eup %1078  ;;  %v735_v15 = vsel %vm734_vm14, %v706_v40, %v733_v52  ;;  %v776_v23 = vsel %vm535_vm2, %v731_v16, %v775_v11  ;;  %vm762_vm2 = vcmp.eq.f32.partialorder %v1647_v50, inf }
 0x17c   : > { %v1081_v14 = vpop.eup %1080  ;;  %v740_v21 = vmul.f32 %v1079_v0, %v707_v48  ;;  %v738_v6 = vsel %vm736_vm15, %v737_v3, %v735_v15 }
 0x17d   : > { %v1083_v26 = vpop.eup %1082  ;;  %v747_v27 = vmul.f32 %v1081_v14, %v1643_v49  ;;  %v777_v5 = vsel %vm537_vm3, %v738_v6, %v776_v23  ;;  %vm1748_vm3 = vcmask 1047559  }
 0x17e   : > { %v742_v29 = vsel %vm741_vm0, %v707_v48, %v740_v21  ;;  %v754_v30 = vmul.f32 %v1083_v26, %v1645_v47  ;;  %vm764_vm0 = vcmp.eq.f32.partialorder %v1647_v50, 0.0 }
 0x17f   : > { %v1085_v28 = vpop.eup %1084  ;;  %v745_v33 = vsel %vm743_vm8, %v744_v54, %v742_v29  ;;  %v749_v63 = vsel %vm748_vm10, %v1643_v49, %v747_v27 }
 0x180   : > { %v761_v34 = vmul.f32 %v1085_v28, %v1647_v50  ;;  %v752_v35 = vsel %vm750_vm7, %v751_v22, %v749_v63  ;;  %v756_v56 = vsel %vm755_vm1, %v1645_v47, %v754_v30  ;;  %v778_v37 = vsel %vm539_vm4, %v745_v33, %v777_v5 }
 0x181   : > { %v759_v4 = vsel %vm757_vm9, %v758_v31, %v756_v56  ;;  %v779_v12 = vsel %vm541_vm5, %v752_v35, %v778_v37  ;;  %vm1749_vm4 = vcmask 261120  }
 0x182   : > { %v763_v39 = vsel %vm762_vm2, %v1647_v50, %v761_v34  ;;  %v780_v42 = vsel %vm543_vm6, %v759_v4, %v779_v12 }
 0x183   : > { %v766_v41 = vsel %vm764_vm0, %v765_v36, %v763_v39 }
 0x184   : > { %v781_v9 = vsel %vm1748_vm3, %v766_v41, %v780_v42 }
 0x185   : > { %783 = vst.msk [vmem:[%s266_s8] sm:$0xff] %vm1749_vm4, %v781_v9 }
 0x186   : > { %1181 = shalt.err (!%p1178_p9)
}
 0x187   : > { %s1182_s6 = scalar_lea.hbm %s1692_s7, 128  ;;  %s1186_s13 = scalar_lea.hbm %s1735_s4, 256 }
 0x188   : > { %p1183_p11 = scmp.ne.s32.totalorder %s1692_s7, %s1182_s6  ;;  %p1187_p8 = scmp.lt.s32.totalorder %s1692_s7, %s1735_s4 }
 0x189   : > { %p1188_p6 = scmp.lt.s32.totalorder %s1186_s13, %s1182_s6 }
 0x18a   : > { %p1184_p3 = pnand %p1183_p11, %p1747_p1 }
 0x18b   : > { %p1189_p13 = por %p1188_p6, %p1187_p8 }
 0x18c   : > { %p1185_p5 = pneg %p1184_p3 }
 0x18e   : > { %p1190_p12 = pnand %p1189_p13, %p1185_p5 }
 0x190   : > { %1193 = shalt.err (!%p1190_p12)
}
 0x191   : > { %969 = dma.vmem_to_hbm [thread:$0]  (%p1747_p1), %s817_s29, 128, %s1692_s7, %s790_s12  }
 0x192 PF: > { %s828_s9 = sand.u32 1, %s1228_s15   ;;  %p1750_p7 = scmp.ne.s32.totalorder %s1743_s28, 0 }
 0x193   : > { %p1751_p10 = scmp.ge.s32.totalorder %s1240_s18, 2  ;;  %s829_s25 = scalar_lea.sflag [#allocation4], %s828_s9 }
 0x195   : > { %p980_p0 = pnand %p1751_p10, %p1750_p7 }
 0x197   : > { %p981_p2 = pneg %p980_p0 }
 0x199   : > { %1219 = dma.done.wait (%p981_p2), %s829_s25, 128  }
 0x19a   : > { %1221 = vsyncadd (%p981_p2), %s829_s25, 4294967168  ;;  %s838_s8 = scalar_lea.sflag [#allocation9], %s828_s9 }
 0x19b   : > { %1223 = dma.done.wait (%p981_p2), %s838_s8, 128  }
 0x19c   : > { %1225 = vsyncadd (%p981_p2), %s838_s8, 4294967168  ;;  %p24_p1 = scmp.ge.s32.totalorder %s1298_s21, 4   ;;  %s1752_s15 = smov %s1232_s16 }
 0x19d   : > { %s1753_s16 = smov %s1236_s17  ;;  %s1754_s17 = smov %s1310_s24 }
 0x19e   : > { %s1755_s18 = smov %s1298_s21  ;;  %26 = sbr.rel (!%p24_p1) target bundleno = 9 (0x9), region = 107 }
 0x1a3   :  { %843 = vsyncpa [#allocation3], 1 }
 0x1a4   :  { %845 = vsyncpa [#allocation3 + $0x1], 1 }
 0x1a5   :  { %846 = vsyncpa [#allocation6], 1 }
 0x1a6   :  { %848 = vsyncpa [#allocation6 + $0x1], 1 }
 0x1a7   :  { %849 = vsyncpa [#allocation4], 1 }
 0x1a8   :  { %851 = vsyncpa [#allocation4 + $0x1], 1 }
 0x1a9   :  { %852 = vsyncpa [#allocation9], 1 }
 0x1aa   :  { %854 = vsyncpa [#allocation9 + $0x1], 1 }

</bundles_post_ra>
